<compile_context>
chip_gen: v7x
topology: tpu7x:2x2x1
jax: 0.10.0
libtpu: 0.0.40
codegen_flags: <defaults>
</compile_context>

<pallas_src>
import jax
import jax.numpy as jnp
from jax.experimental import pallas as pl
from jax.experimental.pallas import tpu as pltpu

ROW_TILE_TARGET = 256     # MXU-filling row tile on v6e/v7x (>=128 on v5e)
FF_TILE_MAX = 2048        # cap on the FF chunk held in VMEM at once


def _round_up(n, m):
    return ((n + m - 1) // m) * m


def _ffn_kernel(x_ref, w1_ref, b1_ref, w2_ref, b2_ref, o_ref, acc_ref):
    """One (row_tile, ff_tile) step of the position-wise FFN.

    Grid: (row tiles, FF chunks). The FF axis is a reduction into acc_ref.
    """
    ff = pl.program_id(1)

    @pl.when(ff == 0)
    def _():
        acc_ref[...] = jnp.zeros_like(acc_ref)

    x = x_ref[...]
    xb = x if x.dtype == jnp.bfloat16 else x.astype(jnp.bfloat16)

    # Linear 1 (bf16 MXU operands, f32 accumulation) + bias + ReLU.
    h = jnp.dot(xb, w1_ref[...], preferred_element_type=jnp.float32) + b1_ref[...]
    h = jnp.maximum(h, 0.0)

    # dropout is identity in eval mode.
    # TODO(synk): training-mode dropout would need pltpu.prng_seed/prng_random_bits.

    # Linear 2: accumulate this FF chunk's contribution in f32.
    acc_ref[...] += jnp.dot(h.astype(jnp.bfloat16), w2_ref[...],
                            preferred_element_type=jnp.float32)

    @pl.when(ff == pl.num_programs(1) - 1)
    def _():
        o_ref[...] = (acc_ref[...] + b2_ref[...]).astype(o_ref.dtype)


def positionwise_feed_forward(x, w1, b1, w2, b2):
    """x: (B, L, D). w1: (D, FF) [bf16], b1: (1, FF), w2: (FF, D) [bf16], b2: (1, D).

    Returns (B, L, D) in x.dtype: w2(relu(w1(x) + b1)) + b2 (dropout = identity).
    """
    Bx, Lx, Dx = x.shape
    FFx = w1.shape[1]
    assert Dx % 128 == 0, "model dim must be lane-dense (multiple of 128)"

    # ---- row tiling: coarse, MXU-filling tiles; pad ragged row counts ----
    n_rows = Bx * Lx
    row_tile = min(ROW_TILE_TARGET, _round_up(n_rows, 8))
    n_rows_pad = _round_up(n_rows, row_tile)
    x2d = x.reshape(n_rows, Dx)
    if n_rows_pad != n_rows:
        x2d = jnp.pad(x2d, ((0, n_rows_pad - n_rows), (0, 0)))
    n_row_tiles = n_rows_pad // row_tile

    # ---- FF tiling: single chunk when it fits, else reduce over chunks ----
    ff_tile = min(FFx, FF_TILE_MAX)
    assert FFx % ff_tile == 0 and ff_tile % 128 == 0
    n_ff = FFx // ff_tile

    # Constant-index (resident) weights/biases can be single-buffered.
    resident = dict(pipeline_mode=pl.Buffered(1)) if n_ff == 1 else {}

    # Only shard rows across TensorCores (v7x) when each core gets real work.
    row_sem = "parallel" if n_rows_pad >= 1024 else "arbitrary"

    # VMEM budget: double-buffered x/o tiles, weights/biases, h, accumulator.
    act = x.dtype.itemsize
    w_buf = 1 if n_ff == 1 else 2
    vmem = (2 * row_tile * Dx * act              # x tiles (double-buffered)
            + 2 * row_tile * Dx * act            # o tiles (double-buffered)
            + w_buf * 2 * Dx * ff_tile * 2       # w1 + w2 (bf16)
            + w_buf * (ff_tile + Dx) * 4         # b1 + b2 (f32)
            + row_tile * ff_tile * 4             # h intermediate (f32)
            + row_tile * Dx * 4)                 # f32 accumulator scratch
    vmem = min(max(int(vmem * 1.5), 16 << 20), 96 << 20)

    out2d = pl.pallas_call(
        _ffn_kernel,
        out_shape=jax.ShapeDtypeStruct((n_rows_pad, Dx), x.dtype),
        grid=(n_row_tiles, n_ff),
        in_specs=[
            pl.BlockSpec((row_tile, Dx), lambda r, f: (r, 0)),               # x rows
            pl.BlockSpec((Dx, ff_tile), lambda r, f: (0, f), **resident),    # w1
            pl.BlockSpec((1, ff_tile), lambda r, f: (0, f), **resident),     # b1
            pl.BlockSpec((ff_tile, Dx), lambda r, f: (f, 0), **resident),    # w2
            pl.BlockSpec((1, Dx), lambda r, f: (0, 0), **resident),          # b2
        ],
        out_specs=pl.BlockSpec((row_tile, Dx), lambda r, f: (r, 0)),
        scratch_shapes=[pltpu.VMEM((row_tile, Dx), jnp.float32)],
        compiler_params=pltpu.CompilerParams(
            dimension_semantics=(row_sem, "arbitrary"),
            vmem_limit_bytes=vmem,
        ),
    )(x2d, w1, b1, w2, b2)

    return out2d[:n_rows].reshape(Bx, Lx, Dx)


if __name__ == "__main__":
    B, L, D, FF = 2, 64, 128, 256
    key = jax.random.PRNGKey(0)
    k_x, k_w1, k_b1, k_w2, k_b2 = jax.random.split(key, 5)

    s = 0.1
    x = jax.random.normal(k_x, (B, L, D), dtype=jnp.float32)
    w1 = s * jax.random.normal(k_w1, (D, FF), dtype=jnp.float32)
    b1 = s * jax.random.normal(k_b1, (1, FF), dtype=jnp.float32)
    w2 = s * jax.random.normal(k_w2, (FF, D), dtype=jnp.float32)
    b2 = s * jax.random.normal(k_b2, (1, D), dtype=jnp.float32)

    # One-time parameter cast (weights live in bf16; hoisted out of the call path).
    w1_bf = w1.astype(jnp.bfloat16)
    w2_bf = w2.astype(jnp.bfloat16)

    fwd = jax.jit(positionwise_feed_forward)
    out = jax.block_until_ready(fwd(x, w1_bf, b1, w2_bf, b2))

    # f32 reference with the same (bf16-rounded) weights; the only deviation is
    # the in-kernel bf16 rounding of x / h on the MXU path.
    h_ref = jnp.maximum(x @ w1_bf.astype(jnp.float32) + b1[0], 0.0)
    ref = h_ref @ w2_bf.astype(jnp.float32) + b2[0]

    assert out.shape == (B, L, D)
    assert jnp.allclose(out, ref, atol=5e-2, rtol=5e-2), "mismatch vs reference"

    print("KERNEL_OK")
</pallas_src>

<mosaic_0001>
module attributes {stable_mosaic.version = 11 : i64} {
  func.func @_ffn_kernel(%arg0: i32, %arg1: i32, %arg2: memref<128x128xf32, #tpu.memory_space<vmem>>, %arg3: memref<128x256xbf16, #tpu.memory_space<vmem>>, %arg4: memref<1x256xf32, #tpu.memory_space<vmem>>, %arg5: memref<256x128xbf16, #tpu.memory_space<vmem>>, %arg6: memref<1x128xf32, #tpu.memory_space<vmem>>, %arg7: memref<128x128xf32, #tpu.memory_space<vmem>>, %arg8: memref<128x128xf32, #tpu.memory_space<vmem>>) attributes {dimension_semantics = [#tpu.dimension_semantics<arbitrary>, #tpu.dimension_semantics<arbitrary>], iteration_bounds = array<i64: 1, 1>, scalar_prefetch = 0 : i64, scratch_operands = 1 : i64, tpu.core_type = #tpu.core_type<tc>, window_params = [{transform_indices = @transform_0, window_bounds = array<i64: 128, 128>}, {pipeline_mode = #tpu.pipeline_mode<synchronous>, transform_indices = @transform_1, window_bounds = array<i64: 128, 256>}, {pipeline_mode = #tpu.pipeline_mode<synchronous>, transform_indices = @transform_2, window_bounds = array<i64: 1, 256>}, {pipeline_mode = #tpu.pipeline_mode<synchronous>, transform_indices = @transform_3, window_bounds = array<i64: 256, 128>}, {pipeline_mode = #tpu.pipeline_mode<synchronous>, transform_indices = @transform_4, window_bounds = array<i64: 1, 128>}, {transform_indices = @transform_5, window_bounds = array<i64: 128, 128>}]} {
    %c0_i32 = arith.constant 0 : i32
    %0 = arith.cmpi eq, %arg1, %c0_i32 : i32
    %1 = arith.extui %0 : i1 to i32
    %c0_i32_0 = arith.constant 0 : i32
    %2 = arith.cmpi ne, %1, %c0_i32_0 : i32
    scf.if %2 {
      %cst_16 = arith.constant 0.000000e+00 : f32
      %21 = vector.broadcast %cst_16 : f32 to vector<128x128xf32>
      %c0_17 = arith.constant 0 : index
      %c0_18 = arith.constant 0 : index
      %22 = vector.load %arg8[%c0_17, %c0_18] : memref<128x128xf32, #tpu.memory_space<vmem>>, vector<128x128xf32>
      tpu.vector_store %arg8[%c0_17, %c0_18], %21 {strides = array<i32>} : memref<128x128xf32, #tpu.memory_space<vmem>>, vector<128x128xf32>,
    } else {
    }
    %c0 = arith.constant 0 : index
    %c0_1 = arith.constant 0 : index
    %3 = vector.load %arg2[%c0, %c0_1] : memref<128x128xf32, #tpu.memory_space<vmem>>, vector<128x128xf32>
    %4 = arith.truncf %3 : vector<128x128xf32> to vector<128x128xbf16>
    %c0_2 = arith.constant 0 : index
    %c0_3 = arith.constant 0 : index
    %5 = vector.load %arg3[%c0_2, %c0_3] : memref<128x256xbf16, #tpu.memory_space<vmem>>, vector<128x256xbf16>
    %cst = arith.constant dense<0.000000e+00> : vector<128x256xf32>
    %6 = tpu.matmul %4, %5, %cst {dimension_numbers = #tpu.dot_dimension_numbers<[1], [0], [0], [1], [0, 0, 1, 1], [], []>} : vector<128x128xbf16>, vector<128x256xbf16>, vector<128x256xf32> -> vector<128x256xf32>
    %c0_4 = arith.constant 0 : index
    %c0_5 = arith.constant 0 : index
    %7 = vector.load %arg4[%c0_4, %c0_5] : memref<1x256xf32, #tpu.memory_space<vmem>>, vector<1x256xf32>
    %8 = vector.broadcast %7 : vector<1x256xf32> to vector<128x256xf32>
    %9 = arith.addf %6, %8 : vector<128x256xf32>
    %cst_6 = arith.constant 0.000000e+00 : f32
    %10 = vector.broadcast %cst_6 : f32 to vector<128x256xf32>
    %11 = arith.maximumf %9, %10 : vector<128x256xf32>
    %c0_7 = arith.constant 0 : index
    %c0_8 = arith.constant 0 : index
    %12 = vector.load %arg8[%c0_7, %c0_8] : memref<128x128xf32, #tpu.memory_space<vmem>>, vector<128x128xf32>
    %13 = arith.truncf %11 : vector<128x256xf32> to vector<128x256xbf16>
    %c0_9 = arith.constant 0 : index
    %c0_10 = arith.constant 0 : index
    %14 = vector.load %arg5[%c0_9, %c0_10] : memref<256x128xbf16, #tpu.memory_space<vmem>>, vector<256x128xbf16>
    %cst_11 = arith.constant dense<0.000000e+00> : vector<128x128xf32>
    %15 = tpu.matmul %13, %14, %cst_11 {dimension_numbers = #tpu.dot_dimension_numbers<[1], [0], [0], [1], [0, 0, 1, 1], [], []>} : vector<128x256xbf16>, vector<256x128xbf16>, vector<128x128xf32> -> vector<128x128xf32>
    %16 = arith.addf %12, %15 : vector<128x128xf32>
    %c0_12 = arith.constant 0 : index
    %c0_13 = arith.constant 0 : index
    %17 = vector.load %arg8[%c0_12, %c0_13] : memref<128x128xf32, #tpu.memory_space<vmem>>, vector<128x128xf32>
    tpu.vector_store %arg8[%c0_12, %c0_13], %16 {strides = array<i32>} : memref<128x128xf32, #tpu.memory_space<vmem>>, vector<128x128xf32>,
    %c0_i32_14 = arith.constant 0 : i32
    %18 = arith.cmpi eq, %arg1, %c0_i32_14 : i32
    %19 = arith.extui %18 : i1 to i32
    %c0_i32_15 = arith.constant 0 : i32
    %20 = arith.cmpi ne, %19, %c0_i32_15 : i32
    scf.if %20 {
      %c0_16 = arith.constant 0 : index
      %c0_17 = arith.constant 0 : index
      %21 = vector.load %arg8[%c0_16, %c0_17] : memref<128x128xf32, #tpu.memory_space<vmem>>, vector<128x128xf32>
      %c0_18 = arith.constant 0 : index
      %c0_19 = arith.constant 0 : index
      %22 = vector.load %arg6[%c0_18, %c0_19] : memref<1x128xf32, #tpu.memory_space<vmem>>, vector<1x128xf32>
      %23 = vector.broadcast %22 : vector<1x128xf32> to vector<128x128xf32>
      %24 = arith.addf %21, %23 : vector<128x128xf32>
      %c0_20 = arith.constant 0 : index
      %c0_21 = arith.constant 0 : index
      %25 = vector.load %arg7[%c0_20, %c0_21] : memref<128x128xf32, #tpu.memory_space<vmem>>, vector<128x128xf32>
      tpu.vector_store %arg7[%c0_20, %c0_21], %24 {strides = array<i32>} : memref<128x128xf32, #tpu.memory_space<vmem>>, vector<128x128xf32>,
    } else {
    }
    return
  }
  func.func @transform_0(%arg0: i32, %arg1: i32) -> (i32, i32) {
    %c0_i32 = arith.constant 0 : i32
    %c0_i32_0 = arith.constant 0 : i32
    return %arg0, %c0_i32 : i32, i32
  }
  func.func @transform_1(%arg0: i32, %arg1: i32) -> (i32, i32) {
    %c0_i32 = arith.constant 0 : i32
    %c0_i32_0 = arith.constant 0 : i32
    return %c0_i32, %arg1 : i32, i32
  }
  func.func @transform_2(%arg0: i32, %arg1: i32) -> (i32, i32) {
    %c0_i32 = arith.constant 0 : i32
    %c0_i32_0 = arith.constant 0 : i32
    return %c0_i32, %arg1 : i32, i32
  }
  func.func @transform_3(%arg0: i32, %arg1: i32) -> (i32, i32) {
    %c0_i32 = arith.constant 0 : i32
    %c0_i32_0 = arith.constant 0 : i32
    return %arg1, %c0_i32 : i32, i32
  }
  func.func @transform_4(%arg0: i32, %arg1: i32) -> (i32, i32) {
    %c0_i32 = arith.constant 0 : i32
    %c0_i32_0 = arith.constant 0 : i32
    %c0_i32_1 = arith.constant 0 : i32
    return %c0_i32, %c0_i32_0 : i32, i32
  }
  func.func @transform_5(%arg0: i32, %arg1: i32) -> (i32, i32) {
    %c0_i32 = arith.constant 0 : i32
    %c0_i32_0 = arith.constant 0 : i32
    return %arg0, %c0_i32 : i32, i32
  }
}

</mosaic_0001>

<bundles_post_ra>
// kernel: positionwise_feed_forward.1
= control target key start
LH: loop header
LB: loop body
LE: loop exit
PB: predicated region body
PF: predicated region fallthrough
CT: control target
= control target key end

     0   :  { %10 = vsyncpa [#allocation4], 0  ;;  %s1136_s0 = inlined_call_operand.hbm [shape: f32[128,128], index: 0, kind: input, shape index: {}]   ;;  %s1137_s1 = inlined_call_operand.hbm [shape: bf16[128,256], index: 1, kind: input, shape index: {}]   ;;  %s1138_s2 = inlined_call_operand.vmem [shape: f32[1,256], index: 2, kind: input, shape index: {}]   ;;  %s1139_s3 = inlined_call_operand.hbm [shape: bf16[256,128], index: 3, kind: input, shape index: {}]   ;;  %s1140_s4 = inlined_call_operand.vmem [shape: f32[1,128], index: 4, kind: input, shape index: {}]   ;;  %s1141_s5 = inlined_call_operand.hbm [shape: f32[128,128], index: 5, kind: output, shape index: {}]  }
   0x1   :  { %11 = vsyncpa [#allocation7], 0 }
   0x2   :  { %12 = vsyncpa [#allocation5], 0  ;;  %s965_s18 = smov [#allocation6]   ;;  %s966_s20 = smov [#allocation3]  }
   0x3   :  { %s30_s19 = sshll.u32 %s965_s18, 4  ;;  %s18_s21 = sshll.u32 %s966_s20, 4  ;;  %s31_s19 = int_to_ptr.vmem [resolvable:$true] %s30_s19  ;;  %s1004_s21 = int_to_ptr.vmem [resolvable:$true] %s18_s21 }
   0x4   :  { %s871_s24 = scalar_lea.hbm %s1137_s1, 2048 }
   0x5   :  { %p872_p0 = scmp.ne.s32.totalorder %s1137_s1, %s871_s24  ;;  %p875_p1 = scmp.lt.u32.totalorder %s871_s24, %s1137_s1 }
   0x7   :  { %p877_p2 = pnand %p875_p1, %p872_p0 }
   0x9   :  { %880 = shalt.err (!%p877_p2)
}
   0xa   :  { %s881_s29 = scalar_lea.vmem %s31_s19, 2048  ;;  %p886_p4 = scmp.lt.s32.totalorder %s31_s19, %s31_s19 }
   0xb   :  { %p882_p3 = scmp.ne.s32.totalorder %s31_s19, %s881_s29  ;;  %p887_p5 = scmp.lt.s32.totalorder %s881_s29, %s881_s29 }
   0xd   :  { %p888_p6 = por %p887_p5, %p886_p4 }
   0xf   :  { %p889_p7 = pnand %p888_p6, %p882_p3 }
  0x11   :  { %892 = shalt.err (!%p889_p7)
}
  0x12   :  { %s967_s30 = smov 128   ;;  %s968_s6 = smov 8  }
  0x13   :  { %36 = dma.hbm_to_vmem [thread:$0]  %s1137_s1, 2048, %s31_s19, [#allocation7], %s967_s30, %s967_s30, %s968_s6  }
  0x14   :  { %s893_s11 = scalar_lea.hbm %s1136_s0, 2048 }
  0x15   :  { %p894_p8 = scmp.ne.s32.totalorder %s1136_s0, %s893_s11  ;;  %p897_p9 = scmp.lt.u32.totalorder %s893_s11, %s1136_s0 }
  0x17   :  { %p899_p10 = pnand %p897_p9, %p894_p8 }
  0x19   :  { %902 = shalt.err (!%p899_p10)
}
  0x1a   :  { %s903_s16 = scalar_lea.vmem %s1004_s21, 2048  ;;  %p908_p12 = scmp.lt.s32.totalorder %s1004_s21, %s1004_s21 }
  0x1b   :  { %p904_p11 = scmp.ne.s32.totalorder %s1004_s21, %s903_s16  ;;  %p909_p13 = scmp.lt.s32.totalorder %s903_s16, %s903_s16 }
  0x1d   :  { %p910_p0 = por %p909_p13, %p908_p12 }
  0x1f   :  { %p911_p1 = pnand %p910_p0, %p904_p11 }
  0x21   :  { %914 = shalt.err (!%p911_p1)
}
  0x22   :  { %24 = dma.hbm_to_vmem [thread:$0]  %s1136_s0, 2048, %s1004_s21, [#allocation4], %s967_s30, %s967_s30, %s968_s6  }
  0x23   :  { %s969_s18 = smov [#allocation8]   ;;  %s915_s23 = scalar_lea.hbm %s1139_s3, 2048 }
  0x24   :  { %s44_s19 = sshll.u32 %s969_s18, 4  ;;  %p916_p2 = scmp.ne.s32.totalorder %s1139_s3, %s915_s23  ;;  %s45_s19 = int_to_ptr.vmem [resolvable:$true] %s44_s19 }
  0x25   :  { %p919_p3 = scmp.lt.u32.totalorder %s915_s23, %s1139_s3 }
  0x27   :  { %p921_p4 = pnand %p919_p3, %p916_p2 }
  0x29   :  { %924 = shalt.err (!%p921_p4)
}
  0x2a   :  { %s925_s28 = scalar_lea.vmem %s45_s19, 2048  ;;  %p930_p6 = scmp.lt.s32.totalorder %s45_s19, %s45_s19 }
  0x2b   :  { %p926_p5 = scmp.ne.s32.totalorder %s45_s19, %s925_s28  ;;  %p931_p7 = scmp.lt.s32.totalorder %s925_s28, %s925_s28 }
  0x2d   :  { %p932_p8 = por %p931_p7, %p930_p6 }
  0x2f   :  { %p933_p9 = pnand %p932_p8, %p926_p5 }
  0x31   :  { %936 = shalt.err (!%p933_p9)
}
  0x32   :  { %s970_s0 = smov 64   ;;  %s971_s21 = smov 4  }
  0x33   :  { %50 = dma.hbm_to_vmem [thread:$0]  %s1139_s3, 2048, %s45_s19, [#allocation7], %s970_s0, %s970_s0, %s971_s21  }
  0x34   :  { %959 = dma.done.wait [#allocation4], 2048  }
  0x35   :  { %960 = vsyncadd [#allocation4], 4294965248 }
  0x36   :  { %961 = dma.done.wait [#allocation7], 4096  }
  0x37   :  { %962 = vsyncadd [#allocation7], 4294963200  ;;  %v972_v0 = vmov 0   ;;  %v831_v1 = vld [vmem:[#allocation6 + $0x4] ss:$8 sps:$4 sm:$0xff]   ;;  %v859_v18 = vld [vmem:[#allocation8 + $0x50] sm:$0xff]   ;;  %v125_v57 = vlaneseq }
  0x38   :  { %247 = vmatprep.mubr.bf16.mxu0 %v972_v0  ;;  %v833_v2 = vld [vmem:[#allocation6] ss:$8 sps:$4 sm:$0xff]   ;;  %215 = vmatprep.subr.bf16.mxu0 %v831_v1  ;;  %v834_v3 = vld [vmem:[#allocation6 + $0x14] ss:$8 sps:$4 sm:$0xff]   ;;  %v836_v4 = vld [vmem:[#allocation6 + $0x10] ss:$8 sps:$4 sm:$0xff]  }
  0x39   :  { %216 = vmatpush1.bf16.msra.mxu0 %v833_v2  ;;  %v837_v5 = vld [vmem:[#allocation6 + $0x24] ss:$8 sps:$4 sm:$0xff]   ;;  %v839_v6 = vld [vmem:[#allocation6 + $0x20] ss:$8 sps:$4 sm:$0xff]   ;;  %v840_v7 = vld [vmem:[#allocation6 + $0x34] ss:$8 sps:$4 sm:$0xff]  }
  0x3a   :  { %217 = vmatprep.subr.bf16.mxu0 %v834_v3  ;;  %v842_v8 = vld [vmem:[#allocation6 + $0x30] ss:$8 sps:$4 sm:$0xff]   ;;  %v843_v9 = vld [vmem:[#allocation6 + $0x44] ss:$8 sps:$4 sm:$0xff]   ;;  %v845_v10 = vld [vmem:[#allocation6 + $0x40] ss:$8 sps:$4 sm:$0xff]  }
  0x3b   :  { %v846_v11 = vld [vmem:[#allocation6 + $0x54] ss:$8 sps:$4 sm:$0xff]   ;;  %v855_v12 = vld [vmem:[#allocation8 + $0x40] sm:$0xff]   ;;  %v848_v13 = vld [vmem:[#allocation6 + $0x50] ss:$8 sps:$4 sm:$0xff]   ;;  %v126_v58 = vshrl.u32 %v125_v57, 7 }
  0x3c   :  { %v856_v14 = vld [vmem:[#allocation8] sm:$0xff]   ;;  %758 = vmatprep.subr.bf16.mxu1 %v855_v12  ;;  %v857_v16 = vld [vmem:[#allocation8 + $0x48] sm:$0xff]   ;;  %v852_v20 = vld [vmem:[#allocation6 + $0x74] ss:$8 sps:$4 sm:$0xff]  }
  0x3d   :  { %218 = vmatpush1.bf16.msra.mxu0 %v836_v4  ;;  %v849_v15 = vld [vmem:[#allocation6 + $0x64] ss:$8 sps:$4 sm:$0xff]   ;;  %759 = vmatpush3.bf16.msra.mxu1 %v856_v14  ;;  %v851_v19 = vld [vmem:[#allocation6 + $0x60] ss:$8 sps:$4 sm:$0xff]   ;;  %v860_v21 = vld [vmem:[#allocation8 + $0x10] sm:$0xff]   ;;  %v127_v59 = vsub.s32 0, %v126_v58 }
  0x3e   :  { %219 = vmatprep.subr.bf16.mxu0 %v837_v5  ;;  %v858_v17 = vld [vmem:[#allocation8 + $0x8] sm:$0xff]   ;;  %760 = vmatprep.subr.bf16.mxu1 %v857_v16  ;;  %v861_v22 = vld [vmem:[#allocation8 + $0x58] sm:$0xff]   ;;  %v83_v24 = vld [vmem:[#allocation3] sm:$0xff]  ;;  %v131_v61 = vsub.s32 1, %v126_v58 }
  0x3f   :  { %v854_v23 = vld [vmem:[#allocation6 + $0x70] ss:$8 sps:$4 sm:$0xff]   ;;  %v84_v25 = vld [vmem:[#allocation3 + $0x8] sm:$0xff]  ;;  %v863_v27 = vld [vmem:[#allocation8 + $0x60] sm:$0xff]  }
  0x40   :  { %v862_v26 = vld [vmem:[#allocation8 + $0x18] sm:$0xff]   ;;  %v99_v28 = vpack.c.bf16 %v84_v25, %v83_v24  ;;  %v864_v29 = vld [vmem:[#allocation8 + $0x20] sm:$0xff]   ;;  %v865_v30 = vld [vmem:[#allocation8 + $0x68] sm:$0xff]  }
  0x41   :  { %220 = vmatpush1.bf16.msra.mxu0 %v839_v6  ;;  %761 = vmatpush3.bf16.msra.mxu1 %v858_v17  ;;  %v85_v31 = vld [vmem:[#allocation3 + $0x10] sm:$0xff]  ;;  %v86_v32 = vld [vmem:[#allocation3 + $0x18] sm:$0xff]  ;;  %v87_v34 = vld [vmem:[#allocation3 + $0x20] sm:$0xff] }
  0x42   :  { %221 = vmatprep.subr.bf16.mxu0 %v840_v7  ;;  %762 = vmatprep.subr.bf16.mxu1 %v859_v18  ;;  %v100_v33 = vpack.c.bf16 %v86_v32, %v85_v31  ;;  %v88_v35 = vld [vmem:[#allocation3 + $0x28] sm:$0xff]  ;;  %v89_v37 = vld [vmem:[#allocation3 + $0x30] sm:$0xff]  ;;  %v90_v38 = vld [vmem:[#allocation3 + $0x38] sm:$0xff] }
  0x43   :  { %v101_v36 = vpack.c.bf16 %v88_v35, %v87_v34  ;;  %v102_v39 = vpack.c.bf16 %v90_v38, %v89_v37  ;;  %v91_v40 = vld [vmem:[#allocation3 + $0x40] sm:$0xff]  ;;  %v92_v41 = vld [vmem:[#allocation3 + $0x48] sm:$0xff]  ;;  %v93_v43 = vld [vmem:[#allocation3 + $0x50] sm:$0xff] }
  0x44   :  { %v103_v42 = vpack.c.bf16 %v92_v41, %v91_v40  ;;  %v94_v44 = vld [vmem:[#allocation3 + $0x58] sm:$0xff]  ;;  %v95_v46 = vld [vmem:[#allocation3 + $0x60] sm:$0xff]  ;;  %v96_v47 = vld [vmem:[#allocation3 + $0x68] sm:$0xff] }
  0x45   :  { %222 = vmatpush1.bf16.msra.mxu0 %v842_v8  ;;  %763 = vmatpush3.bf16.msra.mxu1 %v860_v21  ;;  %v104_v45 = vpack.c.bf16 %v94_v44, %v93_v43  ;;  %v105_v48 = vpack.c.bf16 %v96_v47, %v95_v46  ;;  %v97_v49 = vld [vmem:[#allocation3 + $0x70] sm:$0xff]  ;;  %v98_v50 = vld [vmem:[#allocation3 + $0x78] sm:$0xff]  ;;  %v866_v52 = vld [vmem:[#allocation8 + $0x28] sm:$0xff]  }
  0x46   :  { %223 = vmatprep.subr.bf16.mxu0 %v843_v9  ;;  %764 = vmatprep.subr.bf16.mxu1 %v861_v22  ;;  %v106_v51 = vpack.c.bf16 %v98_v50, %v97_v49  ;;  %v867_v53 = vld [vmem:[#allocation8 + $0x70] sm:$0xff]   ;;  %v869_v55 = vld [vmem:[#allocation8 + $0x78] sm:$0xff]   ;;  %v123_v60 = vld [vmem:[%s1138_s2] sm:$0x3] }
  0x47   :  { %v868_v54 = vld [vmem:[#allocation8 + $0x30] sm:$0xff]   ;;  %v870_v56 = vld [vmem:[#allocation8 + $0x38] sm:$0xff]   ;;  %v1064_v62 = vrot.slane %v123_v60, %v127_v59  ;;  %v1066_v63 = vrot.slane %v123_v60, %v131_v61 }
  0x49   :  { %224 = vmatpush1.bf16.msra.mxu0 %v845_v10  ;;  %765 = vmatpush3.bf16.msra.mxu1 %v862_v26 }
  0x4a   :  { %225 = vmatprep.subr.bf16.mxu0 %v846_v11  ;;  %766 = vmatprep.subr.bf16.mxu1 %v863_v27 }
  0x4d   :  { %226 = vmatpush1.bf16.msra.mxu0 %v848_v13  ;;  %767 = vmatpush3.bf16.msra.mxu1 %v864_v29 }
  0x4e   :  { %227 = vmatprep.subr.bf16.mxu0 %v849_v15  ;;  %768 = vmatprep.subr.bf16.mxu1 %v865_v30 }
  0x51   :  { %228 = vmatpush1.bf16.msra.mxu0 %v851_v19  ;;  %769 = vmatpush3.bf16.msra.mxu1 %v866_v52 }
  0x52   :  { %229 = vmatprep.subr.bf16.mxu0 %v852_v20  ;;  %770 = vmatprep.subr.bf16.mxu1 %v867_v53 }
  0x55   :  { %230 = vmatpush1.bf16.msra.mxu0 %v854_v23  ;;  %771 = vmatpush3.bf16.msra.mxu1 %v868_v54 }
  0x56   :  { %772 = vmatprep.subr.bf16.mxu1 %v869_v55 }
  0x58   :  { %248 = vmatmul.mubr.bf16.vlgmr.msra.gmra.mrb[0].mxu0 %v99_v28 }
  0x59   :  { %257 = vmatprep.mubr.bf16.mxu0 %v972_v0  ;;  %773 = vmatpush3.bf16.msra.mxu1 %v870_v56 }
  0x60   :  { %258 = vmatmul.mubr.bf16.gmra.mrb[4].mxu0 %v100_v33 }
  0x61   :  { %267 = vmatprep.mubr.bf16.mxu0 %v972_v0 }
  0x68   :  { %268 = vmatmul.mubr.bf16.gmra.mrb[8].mxu0 %v101_v36 }
  0x69   :  { %277 = vmatprep.mubr.bf16.mxu0 %v972_v0 }
  0x70   :  { %278 = vmatmul.mubr.bf16.gmra.mrb[12].mxu0 %v102_v39 }
  0x71   :  { %287 = vmatprep.mubr.bf16.mxu0 %v972_v0 }
  0x78   :  { %288 = vmatmul.mubr.bf16.gmra.mrb[16].mxu0 %v103_v42 }
  0x79   :  { %297 = vmatprep.mubr.bf16.mxu0 %v972_v0 }
  0x80   :  { %298 = vmatmul.mubr.bf16.gmra.mrb[20].mxu0 %v104_v45 }
  0x81   :  { %307 = vmatprep.mubr.bf16.mxu0 %v972_v0 }
  0x88   :  { %308 = vmatmul.mubr.bf16.gmra.mrb[24].mxu0 %v105_v48 }
  0x89   :  { %317 = vmatprep.mubr.bf16.mxu0 %v972_v0 }
  0x90   :  { %318 = vmatmul.mubr.bf16.gmra.mrb[28].mxu0 %v106_v51 }
 0x12b   :  { %v249_v0 = vpop.f32.mrb[0].mxu0 }
 0x12c   :  { %v250_v1 = vadd.f32 %v249_v0, %v1064_v62  ;;  %v251_v2 = vpop.f32.mrb[1].mxu0 }
 0x12d   :  { %v252_v3 = vadd.f32 %v251_v2, %v1066_v63  ;;  %v253_v4 = vpop.f32.mrb[2].mxu0 }
 0x12e   :  { %v254_v5 = vadd.f32 %v253_v4, %v1064_v62  ;;  %v255_v6 = vpop.f32.mrb[3].mxu0  ;;  %v328_v8 = vmax.f32 %v250_v1, 0.0 }
 0x12f   :  { %v256_v7 = vadd.f32 %v255_v6, %v1066_v63  ;;  %v329_v10 = vmax.f32 %v252_v3, 0.0 }
 0x130   :  { %v330_v9 = vmax.f32 %v254_v5, 0.0 }
 0x131   :  { %v331_v11 = vmax.f32 %v256_v7, 0.0 }
 0x132   :  { %v376_v12 = vpack.c.bf16 %v330_v9, %v328_v8 }
 0x133   :  { %v259_v13 = vpop.f32.mrb[4].mxu0  ;;  %v377_v14 = vpack.c.bf16 %v331_v11, %v329_v10 }
 0x134   :  { %v260_v15 = vadd.f32 %v259_v13, %v1064_v62  ;;  %v261_v16 = vpop.f32.mrb[5].mxu0 }
 0x135   :  { %v262_v17 = vadd.f32 %v261_v16, %v1066_v63  ;;  %v263_v18 = vpop.f32.mrb[6].mxu0  ;;  %552 = vmatprep.mubr.bf16.mxu1 %v377_v14 }
 0x136   :  { %v264_v19 = vadd.f32 %v263_v18, %v1064_v62  ;;  %v265_v20 = vpop.f32.mrb[7].mxu0  ;;  %553 = vmatmul.mubr.bf16.vlgmr.msra.gmra.mrb[0].mxu1 %v376_v12  ;;  %v332_v22 = vmax.f32 %v260_v15, 0.0 }
 0x137   :  { %v266_v21 = vadd.f32 %v265_v20, %v1066_v63  ;;  %v333_v24 = vmax.f32 %v262_v17, 0.0 }
 0x138   :  { %v334_v23 = vmax.f32 %v264_v19, 0.0 }
 0x139   :  { %v335_v25 = vmax.f32 %v266_v21, 0.0 }
 0x13a   :  { %v378_v26 = vpack.c.bf16 %v334_v23, %v332_v22 }
 0x13b   :  { %v379_v27 = vpack.c.bf16 %v335_v25, %v333_v24  ;;  %v269_v28 = vpop.f32.mrb[8].mxu0 }
 0x13c   :  { %v270_v29 = vadd.f32 %v269_v28, %v1064_v62  ;;  %v271_v30 = vpop.f32.mrb[9].mxu0 }
 0x13d   :  { %v272_v31 = vadd.f32 %v271_v30, %v1066_v63  ;;  %v273_v32 = vpop.f32.mrb[10].mxu0  ;;  %560 = vmatprep.mubr.bf16.mxu1 %v379_v27 }
 0x13e   :  { %v274_v33 = vadd.f32 %v273_v32, %v1064_v62  ;;  %v275_v34 = vpop.f32.mrb[11].mxu0  ;;  %561 = vmatmul.mubr.bf16.gmra.mrb[4].mxu1 %v378_v26  ;;  %v336_v36 = vmax.f32 %v270_v29, 0.0 }
 0x13f   :  { %v276_v35 = vadd.f32 %v275_v34, %v1066_v63  ;;  %v337_v38 = vmax.f32 %v272_v31, 0.0 }
 0x140   :  { %v338_v37 = vmax.f32 %v274_v33, 0.0 }
 0x141   :  { %v339_v39 = vmax.f32 %v276_v35, 0.0 }
 0x142   :  { %v380_v40 = vpack.c.bf16 %v338_v37, %v336_v36 }
 0x143   :  { %v381_v41 = vpack.c.bf16 %v339_v39, %v337_v38  ;;  %v279_v42 = vpop.f32.mrb[12].mxu0 }
 0x144   :  { %v280_v43 = vadd.f32 %v279_v42, %v1064_v62  ;;  %v281_v44 = vpop.f32.mrb[13].mxu0 }
 0x145   :  { %v282_v45 = vadd.f32 %v281_v44, %v1066_v63  ;;  %v283_v46 = vpop.f32.mrb[14].mxu0  ;;  %568 = vmatprep.mubr.bf16.mxu1 %v381_v41 }
 0x146   :  { %v284_v47 = vadd.f32 %v283_v46, %v1064_v62  ;;  %v285_v48 = vpop.f32.mrb[15].mxu0  ;;  %569 = vmatmul.mubr.bf16.gmra.mrb[8].mxu1 %v380_v40  ;;  %v340_v50 = vmax.f32 %v280_v43, 0.0 }
 0x147   :  { %v286_v49 = vadd.f32 %v285_v48, %v1066_v63  ;;  %v341_v52 = vmax.f32 %v282_v45, 0.0 }
 0x148   :  { %v342_v51 = vmax.f32 %v284_v47, 0.0 }
 0x149   :  { %v343_v53 = vmax.f32 %v286_v49, 0.0 }
 0x14a   :  { %v382_v54 = vpack.c.bf16 %v342_v51, %v340_v50 }
 0x14b   :  { %v383_v55 = vpack.c.bf16 %v343_v53, %v341_v52  ;;  %v289_v56 = vpop.f32.mrb[16].mxu0  ;;  %v1103_v52 = vld [vmem:[%s1140_s4] ss:$0 sm:$0xff]  ;;  %s973_s4 = smov [#allocation9]  }
 0x14c   :  { %v290_v57 = vadd.f32 %v289_v56, %v1064_v62  ;;  %v291_v58 = vpop.f32.mrb[17].mxu0  ;;  %s712_s10 = sshll.u32 %s973_s4, 4  ;;  %s713_s10 = int_to_ptr.vmem [resolvable:$true] %s712_s10 }
 0x14d   :  { %v292_v59 = vadd.f32 %v291_v58, %v1066_v63  ;;  %v293_v60 = vpop.f32.mrb[18].mxu0  ;;  %576 = vmatprep.mubr.bf16.mxu1 %v383_v55  ;;  %s937_s11 = scalar_lea.vmem %s713_s10, 2048  ;;  %p942_p11 = scmp.lt.s32.totalorder %s713_s10, %s713_s10 }
 0x14e   :  { %v294_v61 = vadd.f32 %v293_v60, %v1064_v62  ;;  %v295_v0 = vpop.f32.mrb[19].mxu0  ;;  %577 = vmatmul.mubr.bf16.gmra.mrb[12].mxu1 %v382_v54  ;;  %v344_v2 = vmax.f32 %v290_v57, 0.0  ;;  %p938_p10 = scmp.ne.s32.totalorder %s713_s10, %s937_s11  ;;  %p943_p12 = scmp.lt.s32.totalorder %s937_s11, %s937_s11 }
 0x14f   :  { %v296_v1 = vadd.f32 %v295_v0, %v1066_v63  ;;  %v345_v4 = vmax.f32 %v292_v59, 0.0 }
 0x150   :  { %v346_v3 = vmax.f32 %v294_v61, 0.0  ;;  %p944_p13 = por %p943_p12, %p942_p11 }
 0x151   :  { %v347_v5 = vmax.f32 %v296_v1, 0.0 }
 0x152   :  { %v384_v6 = vpack.c.bf16 %v346_v3, %v344_v2  ;;  %p945_p0 = pnand %p944_p13, %p938_p10 }
 0x153   :  { %v385_v7 = vpack.c.bf16 %v347_v5, %v345_v4  ;;  %v299_v8 = vpop.f32.mrb[20].mxu0 }
 0x154   :  { %v300_v9 = vadd.f32 %v299_v8, %v1064_v62  ;;  %v301_v10 = vpop.f32.mrb[21].mxu0 }
 0x155   :  { %v302_v11 = vadd.f32 %v301_v10, %v1066_v63  ;;  %v303_v12 = vpop.f32.mrb[22].mxu0  ;;  %584 = vmatprep.mubr.bf16.mxu1 %v385_v7 }
 0x156   :  { %v304_v13 = vadd.f32 %v303_v12, %v1064_v62  ;;  %v305_v14 = vpop.f32.mrb[23].mxu0  ;;  %585 = vmatmul.mubr.bf16.gmra.mrb[16].mxu1 %v384_v6  ;;  %v348_v16 = vmax.f32 %v300_v9, 0.0 }
 0x157   :  { %v306_v15 = vadd.f32 %v305_v14, %v1066_v63  ;;  %v349_v18 = vmax.f32 %v302_v11, 0.0 }
 0x158   :  { %v350_v17 = vmax.f32 %v304_v13, 0.0 }
 0x159   :  { %v351_v19 = vmax.f32 %v306_v15, 0.0 }
 0x15a   :  { %v386_v20 = vpack.c.bf16 %v350_v17, %v348_v16 }
 0x15b   :  { %v387_v21 = vpack.c.bf16 %v351_v19, %v349_v18  ;;  %v309_v22 = vpop.f32.mrb[24].mxu0 }
 0x15c   :  { %v310_v23 = vadd.f32 %v309_v22, %v1064_v62  ;;  %v311_v24 = vpop.f32.mrb[25].mxu0 }
 0x15d   :  { %v312_v25 = vadd.f32 %v311_v24, %v1066_v63  ;;  %v313_v26 = vpop.f32.mrb[26].mxu0  ;;  %592 = vmatprep.mubr.bf16.mxu1 %v387_v21 }
 0x15e   :  { %v314_v27 = vadd.f32 %v313_v26, %v1064_v62  ;;  %v315_v28 = vpop.f32.mrb[27].mxu0  ;;  %593 = vmatmul.mubr.bf16.gmra.mrb[20].mxu1 %v386_v20  ;;  %v352_v30 = vmax.f32 %v310_v23, 0.0 }
 0x15f   :  { %v316_v29 = vadd.f32 %v315_v28, %v1066_v63  ;;  %v353_v32 = vmax.f32 %v312_v25, 0.0 }
 0x160   :  { %v354_v31 = vmax.f32 %v314_v27, 0.0 }
 0x161   :  { %v355_v33 = vmax.f32 %v316_v29, 0.0 }
 0x162   :  { %v388_v34 = vpack.c.bf16 %v354_v31, %v352_v30 }
 0x163   :  { %v389_v35 = vpack.c.bf16 %v355_v33, %v353_v32  ;;  %v319_v36 = vpop.f32.mrb[28].mxu0 }
 0x164   :  { %v320_v37 = vadd.f32 %v319_v36, %v1064_v62  ;;  %v321_v38 = vpop.f32.mrb[29].mxu0 }
 0x165   :  { %v322_v39 = vadd.f32 %v321_v38, %v1066_v63  ;;  %v323_v40 = vpop.f32.mrb[30].mxu0  ;;  %600 = vmatprep.mubr.bf16.mxu1 %v389_v35 }
 0x166   :  { %v324_v41 = vadd.f32 %v323_v40, %v1064_v62  ;;  %v325_v42 = vpop.f32.mrb[31].mxu0  ;;  %601 = vmatmul.mubr.bf16.gmra.mrb[24].mxu1 %v388_v34  ;;  %v356_v44 = vmax.f32 %v320_v37, 0.0 }
 0x167   :  { %v326_v43 = vadd.f32 %v325_v42, %v1066_v63  ;;  %v357_v46 = vmax.f32 %v322_v39, 0.0 }
 0x168   :  { %v358_v45 = vmax.f32 %v324_v41, 0.0 }
 0x169   :  { %v359_v47 = vmax.f32 %v326_v43, 0.0 }
 0x16a   :  { %v390_v48 = vpack.c.bf16 %v358_v45, %v356_v44 }
 0x16b   :  { %v391_v49 = vpack.c.bf16 %v359_v47, %v357_v46 }
 0x16d   :  { %608 = vmatprep.mubr.bf16.mxu1 %v391_v49 }
 0x16e   :  { %609 = vmatmul.mubr.bf16.gmra.mrb[28].mxu1 %v390_v48 }
 0x209   :  { %v774_v50 = vpop.f32.mrb[0].mxu1 }
 0x20a   :  { %v775_v51 = vpop.f32.mrb[1].mxu1 }
 0x20b   :  { %v776_v62 = vadd.f32 %v775_v51, %v774_v50  ;;  %v777_v53 = vpop.f32.mrb[2].mxu1 }
 0x20c   :  { %v778_v54 = vpop.f32.mrb[3].mxu1 }
 0x20d   :  { %v675_v63 = vadd.f32 %v776_v62, %v1103_v52  ;;  %v779_v55 = vadd.f32 %v778_v54, %v777_v53 }
 0x20f   :  { %691 = vst [vmem:[#allocation9] sm:$0xff] %v675_v63  ;;  %v676_v56 = vadd.f32 %v779_v55, %v1103_v52 }
 0x211   :  { %692 = vst [vmem:[#allocation9 + $0x8] sm:$0xff] %v676_v56  ;;  %v780_v57 = vpop.f32.mrb[4].mxu1 }
 0x212   :  { %v781_v58 = vpop.f32.mrb[5].mxu1 }
 0x213   :  { %v782_v59 = vadd.f32 %v781_v58, %v780_v57  ;;  %v783_v60 = vpop.f32.mrb[6].mxu1 }
 0x214   :  { %v784_v61 = vpop.f32.mrb[7].mxu1 }
 0x215   :  { %v677_v0 = vadd.f32 %v782_v59, %v1103_v52  ;;  %v785_v1 = vadd.f32 %v784_v61, %v783_v60 }
 0x217   :  { %693 = vst [vmem:[#allocation9 + $0x10] sm:$0xff] %v677_v0  ;;  %v678_v2 = vadd.f32 %v785_v1, %v1103_v52 }
 0x219   :  { %694 = vst [vmem:[#allocation9 + $0x18] sm:$0xff] %v678_v2  ;;  %v786_v3 = vpop.f32.mrb[8].mxu1 }
 0x21a   :  { %v787_v4 = vpop.f32.mrb[9].mxu1 }
 0x21b   :  { %v788_v5 = vadd.f32 %v787_v4, %v786_v3  ;;  %v789_v6 = vpop.f32.mrb[10].mxu1 }
 0x21c   :  { %v790_v7 = vpop.f32.mrb[11].mxu1 }
 0x21d   :  { %v679_v8 = vadd.f32 %v788_v5, %v1103_v52  ;;  %v791_v9 = vadd.f32 %v790_v7, %v789_v6 }
 0x21f   :  { %695 = vst [vmem:[#allocation9 + $0x20] sm:$0xff] %v679_v8  ;;  %v680_v10 = vadd.f32 %v791_v9, %v1103_v52 }
 0x221   :  { %696 = vst [vmem:[#allocation9 + $0x28] sm:$0xff] %v680_v10  ;;  %v792_v11 = vpop.f32.mrb[12].mxu1 }
 0x222   :  { %v793_v12 = vpop.f32.mrb[13].mxu1 }
 0x223   :  { %v794_v13 = vadd.f32 %v793_v12, %v792_v11  ;;  %v795_v14 = vpop.f32.mrb[14].mxu1 }
 0x224   :  { %v796_v15 = vpop.f32.mrb[15].mxu1 }
 0x225   :  { %v681_v16 = vadd.f32 %v794_v13, %v1103_v52  ;;  %v797_v17 = vadd.f32 %v796_v15, %v795_v14 }
 0x227   :  { %697 = vst [vmem:[#allocation9 + $0x30] sm:$0xff] %v681_v16  ;;  %v682_v18 = vadd.f32 %v797_v17, %v1103_v52 }
 0x229   :  { %698 = vst [vmem:[#allocation9 + $0x38] sm:$0xff] %v682_v18  ;;  %v798_v19 = vpop.f32.mrb[16].mxu1 }
 0x22a   :  { %v799_v20 = vpop.f32.mrb[17].mxu1 }
 0x22b   :  { %v800_v21 = vadd.f32 %v799_v20, %v798_v19  ;;  %v801_v22 = vpop.f32.mrb[18].mxu1 }
 0x22c   :  { %v802_v23 = vpop.f32.mrb[19].mxu1 }
 0x22d   :  { %v683_v24 = vadd.f32 %v800_v21, %v1103_v52  ;;  %v803_v25 = vadd.f32 %v802_v23, %v801_v22 }
 0x22f   :  { %699 = vst [vmem:[#allocation9 + $0x40] sm:$0xff] %v683_v24  ;;  %v684_v26 = vadd.f32 %v803_v25, %v1103_v52 }
 0x231   :  { %700 = vst [vmem:[#allocation9 + $0x48] sm:$0xff] %v684_v26  ;;  %v804_v27 = vpop.f32.mrb[20].mxu1 }
 0x232   :  { %v805_v28 = vpop.f32.mrb[21].mxu1 }
 0x233   :  { %v806_v29 = vadd.f32 %v805_v28, %v804_v27  ;;  %v807_v30 = vpop.f32.mrb[22].mxu1 }
 0x234   :  { %v808_v31 = vpop.f32.mrb[23].mxu1 }
 0x235   :  { %v685_v32 = vadd.f32 %v806_v29, %v1103_v52  ;;  %v809_v33 = vadd.f32 %v808_v31, %v807_v30 }
 0x237   :  { %701 = vst [vmem:[#allocation9 + $0x50] sm:$0xff] %v685_v32  ;;  %v686_v34 = vadd.f32 %v809_v33, %v1103_v52 }
 0x239   :  { %702 = vst [vmem:[#allocation9 + $0x58] sm:$0xff] %v686_v34  ;;  %v810_v35 = vpop.f32.mrb[24].mxu1 }
 0x23a   :  { %v811_v36 = vpop.f32.mrb[25].mxu1 }
 0x23b   :  { %v812_v37 = vadd.f32 %v811_v36, %v810_v35  ;;  %v813_v38 = vpop.f32.mrb[26].mxu1 }
 0x23c   :  { %v814_v39 = vpop.f32.mrb[27].mxu1 }
 0x23d   :  { %v687_v40 = vadd.f32 %v812_v37, %v1103_v52  ;;  %v815_v41 = vadd.f32 %v814_v39, %v813_v38 }
 0x23f   :  { %703 = vst [vmem:[#allocation9 + $0x60] sm:$0xff] %v687_v40  ;;  %v688_v42 = vadd.f32 %v815_v41, %v1103_v52 }
 0x241   :  { %704 = vst [vmem:[#allocation9 + $0x68] sm:$0xff] %v688_v42  ;;  %v816_v43 = vpop.f32.mrb[28].mxu1 }
 0x242   :  { %v817_v44 = vpop.f32.mrb[29].mxu1 }
 0x243   :  { %v818_v45 = vadd.f32 %v817_v44, %v816_v43  ;;  %v819_v46 = vpop.f32.mrb[30].mxu1 }
 0x244   :  { %v820_v47 = vpop.f32.mrb[31].mxu1 }
 0x245   :  { %v689_v48 = vadd.f32 %v818_v45, %v1103_v52  ;;  %v821_v49 = vadd.f32 %v820_v47, %v819_v46 }
 0x247   :  { %705 = vst [vmem:[#allocation9 + $0x70] sm:$0xff] %v689_v48  ;;  %v690_v50 = vadd.f32 %v821_v49, %v1103_v52 }
 0x249   :  { %706 = vst [vmem:[#allocation9 + $0x78] sm:$0xff] %v690_v50 }
 0x24a   :  { %948 = shalt.err (!%p945_p0)
}
 0x24b   :  { %s949_s14 = scalar_lea.hbm %s1141_s5, 2048 }
 0x24c   :  { %p950_p1 = scmp.ne.s32.totalorder %s1141_s5, %s949_s14  ;;  %p953_p2 = scmp.lt.u32.totalorder %s949_s14, %s1141_s5 }
 0x24e   :  { %p955_p3 = pnand %p953_p2, %p950_p1 }
 0x250   :  { %958 = shalt.err (!%p955_p3)
}
 0x251   :  { %718 = dma.vmem_to_hbm [thread:$0]  %s713_s10, 2048, %s1141_s5, [#allocation5], %s967_s30, %s967_s30, %s968_s6  }
 0x252   :  { %963 = dma.done.wait [#allocation5], 2048  }
 0x253   :  { %964 = vsyncadd [#allocation5], 4294965248 }
 0x254   :  { %722 = vsyncpa [#allocation4], 1 }
 0x255   :  { %723 = vsyncpa [#allocation7], 1 }
 0x256   :  { %724 = vsyncpa [#allocation5], 1 }

</bundles_post_ra>
